<compile_context>
chip_gen: v7x
topology: tpu7x:2x2x1
jax: 0.10.0
libtpu: 0.0.40
codegen_flags: <defaults>
</compile_context>

<pallas_src>
import functools

import jax
import jax.numpy as jnp
from jax import lax
from jax.experimental import pallas as pl
from jax.experimental.pallas import tpu as pltpu

EPS = 1e-5  # PyTorch nn.LayerNorm default eps


# ------------------------------- tiling helpers ------------------------------
def _round_up(n, m):
    return ((n + m - 1) // m) * m


def _pick_tile_rows(rows, requested):
    # Row tile must be a multiple of 8 (f32 sublane) and need not exceed the
    # (padded) problem size.
    return max(8, min(_round_up(requested, 8), _round_up(rows, 8)))


def _pad_rows(x, rows_padded):
    rows = x.shape[0]
    if rows_padded == rows:
        return x
    return jnp.pad(x, ((0, rows_padded - rows), (0, 0)))


# ------------------- fused LN -> linear -> dropout -> residual ----------------
def fused_block_kernel(x_ref, g_ref, b_ref, w_ref, wb_ref, *rest, p):
    if p > 0.0:
        u_ref, o_ref = rest
    else:
        (o_ref,) = rest

    x = x_ref[...].astype(jnp.float32)
    mean = jnp.mean(x, axis=-1, keepdims=True)
    xc = x - mean
    var = jnp.mean(xc * xc, axis=-1, keepdims=True)          # biased (matches torch)
    normed = (xc * lax.rsqrt(var + EPS)
              * g_ref[...].astype(jnp.float32)
              + b_ref[...].astype(jnp.float32))

    # MXU matmul: (tile_rows, D) x (D, D) with f32 accumulation.
    y = jnp.dot(normed.astype(w_ref.dtype), w_ref[...],
                preferred_element_type=jnp.float32)
    y = y + wb_ref[...].astype(jnp.float32)

    if p > 0.0:
        # Inverted dropout; 1/(1-p) is a compile-time constant.
        keep = u_ref[...] >= p
        y = jnp.where(keep, y * (1.0 / (1.0 - p)), 0.0)

    o_ref[...] = (x + y).astype(o_ref.dtype)


def fused_sublayer_connection(x2, gamma, beta, W, wb, *, p, training,
                              key=None, tile_rows=512):
    R, D = x2.shape
    tr = _pick_tile_rows(R, tile_rows)
    R_pad = _round_up(R, tr)
    xp = _pad_rows(x2, R_pad)

    use_drop = bool(training) and float(p) > 0.0
    p_eff = float(p) if use_drop else 0.0

    row_spec = pl.BlockSpec((tr, D), lambda i: (i, 0))
    vec_spec = pl.BlockSpec((1, D), lambda i: (0, 0))
    # TODO(synk): for large d_model (>~2048 f32 on v7x's 64 MiB VMEM) tile the
    # weight along K/N with a reduction grid axis + VMEM accumulator instead of
    # holding the full (D, D) block resident.
    in_specs = [row_spec, vec_spec, vec_spec,
                pl.BlockSpec((D, D), lambda i: (0, 0)), vec_spec]
    inputs = [xp, gamma.reshape(1, D), beta.reshape(1, D), W, wb.reshape(1, D)]

    if use_drop:
        u = jax.random.uniform(key, (R_pad, D), dtype=jnp.float32)
        in_specs.append(row_spec)
        inputs.append(u)

    out = pl.pallas_call(
        functools.partial(fused_block_kernel, p=p_eff),
        out_shape=jax.ShapeDtypeStruct((R_pad, D), x2.dtype),
        grid=(R_pad // tr,),
        in_specs=in_specs,
        out_specs=row_spec,
        compiler_params=pltpu.CompilerParams(dimension_semantics=("parallel",)),
    )(*inputs)
    return out[:R]


# ----------------------------- LayerNorm kernel ------------------------------
def layernorm_kernel(x_ref, g_ref, b_ref, o_ref):
    x = x_ref[...].astype(jnp.float32)
    mean = jnp.mean(x, axis=-1, keepdims=True)
    xc = x - mean
    var = jnp.mean(xc * xc, axis=-1, keepdims=True)
    y = (xc * lax.rsqrt(var + EPS)
         * g_ref[...].astype(jnp.float32)
         + b_ref[...].astype(jnp.float32))
    o_ref[...] = y.astype(o_ref.dtype)


def layernorm(x2, gamma, beta, *, tile_rows=512):
    R, D = x2.shape
    tr = _pick_tile_rows(R, tile_rows)
    R_pad = _round_up(R, tr)
    xp = _pad_rows(x2, R_pad)
    row_spec = pl.BlockSpec((tr, D), lambda i: (i, 0))
    vec_spec = pl.BlockSpec((1, D), lambda i: (0, 0))
    out = pl.pallas_call(
        layernorm_kernel,
        out_shape=jax.ShapeDtypeStruct((R_pad, D), x2.dtype),
        grid=(R_pad // tr,),
        in_specs=[row_spec, vec_spec, vec_spec],
        out_specs=row_spec,
        compiler_params=pltpu.CompilerParams(dimension_semantics=("parallel",)),
    )(xp, gamma.reshape(1, D), beta.reshape(1, D))
    return out[:R]


# ------------------------ demo sublayer: linear kernel ------------------------
def linear_kernel(h_ref, w_ref, b_ref, o_ref):
    acc = jnp.dot(h_ref[...].astype(w_ref.dtype), w_ref[...],
                  preferred_element_type=jnp.float32)
    o_ref[...] = (acc + b_ref[...].astype(jnp.float32)).astype(o_ref.dtype)


def linear(h, w, b, *, tile_rows=512):
    R, D_in = h.shape
    D_out = w.shape[1]
    tr = _pick_tile_rows(R, tile_rows)
    R_pad = _round_up(R, tr)
    hp = _pad_rows(h, R_pad)
    out = pl.pallas_call(
        linear_kernel,
        out_shape=jax.ShapeDtypeStruct((R_pad, D_out), h.dtype),
        grid=(R_pad // tr,),
        in_specs=[pl.BlockSpec((tr, D_in), lambda i: (i, 0)),
                  pl.BlockSpec((D_in, D_out), lambda i: (0, 0)),
                  pl.BlockSpec((1, D_out), lambda i: (0, 0))],
        out_specs=pl.BlockSpec((tr, D_out), lambda i: (i, 0)),
        compiler_params=pltpu.CompilerParams(dimension_semantics=("parallel",)),
    )(hp, w, b.reshape(1, D_out))
    return out[:R]


# ------------------- dropout + residual (generic fallback) -------------------
def dropout_residual_kernel(x_ref, y_ref, *rest, p):
    if p > 0.0:
        u_ref, o_ref = rest
    else:
        (o_ref,) = rest
    x = x_ref[...].astype(jnp.float32)
    y = y_ref[...].astype(jnp.float32)
    if p > 0.0:
        keep = u_ref[...] >= p
        y = jnp.where(keep, y * (1.0 / (1.0 - p)), 0.0)
    o_ref[...] = (x + y).astype(o_ref.dtype)


def dropout_residual(x2, y2, *, p, training, key=None, tile_rows=512):
    R, D = x2.shape
    tr = _pick_tile_rows(R, tile_rows)
    R_pad = _round_up(R, tr)
    xp = _pad_rows(x2, R_pad)
    yp = _pad_rows(y2, R_pad)

    use_drop = bool(training) and float(p) > 0.0
    p_eff = float(p) if use_drop else 0.0

    row_spec = pl.BlockSpec((tr, D), lambda i: (i, 0))
    in_specs = [row_spec, row_spec]
    inputs = [xp, yp]
    if use_drop:
        u = jax.random.uniform(key, (R_pad, D), dtype=jnp.float32)
        in_specs.append(row_spec)
        inputs.append(u)

    out = pl.pallas_call(
        functools.partial(dropout_residual_kernel, p=p_eff),
        out_shape=jax.ShapeDtypeStruct((R_pad, D), x2.dtype),
        grid=(R_pad // tr,),
        in_specs=in_specs,
        out_specs=row_spec,
        compiler_params=pltpu.CompilerParams(dimension_semantics=("parallel",)),
    )(*inputs)
    return out[:R]


# ------------------------------ module wrappers -------------------------------
class PallasLinear:
    """Linear(d_model, d_model) sublayer; enables the fully fused path."""

    def __init__(self, W, b):
        self.W = W
        self.b = b

    def __call__(self, h):  # generic-path callable form
        D = self.W.shape[0]
        return linear(h.reshape(-1, D), self.W, self.b).reshape(h.shape)


class SublayerConnection:
    """x + dropout(sublayer(LayerNorm(x))) — Pallas-backed.

    If `sublayer` is a PallasLinear of matching size, the whole block runs as
    ONE fused pallas_call.  Arbitrary callables fall back to:
    LayerNorm kernel -> sublayer -> fused dropout+residual kernel.
    """

    def __init__(self, d_model, dropout):
        self.d_model = d_model
        self.p = float(dropout)
        # nn.LayerNorm(d_model): weight=ones, bias=zeros
        self.gamma = jnp.ones((d_model,), jnp.float32)
        self.beta = jnp.zeros((d_model,), jnp.float32)

    def __call__(self, x, sublayer, *, training=True, rng=None):
        shape = x.shape
        x2 = x.reshape(-1, self.d_model)
        if training and self.p > 0.0 and rng is None:
            rng = jax.random.PRNGKey(0)

        if (isinstance(sublayer, PallasLinear)
                and sublayer.W.shape == (self.d_model, self.d_model)):
            out = fused_sublayer_connection(
                x2, self.gamma, self.beta, sublayer.W, sublayer.b,
                p=self.p, training=training, key=rng)
        else:
            normed = layernorm(x2, self.gamma, self.beta)
            y = sublayer(normed.reshape(shape)).reshape(-1, self.d_model)
            out = dropout_residual(x2, y, p=self.p, training=training, key=rng)
        return out.reshape(shape)


if __name__ == "__main__":
    B, S, D = 2, 8, 128     # batch=2, seq=8, d_model=128 (lane-friendly)
    key = jax.random.PRNGKey(0)
    kx, kw, kd = jax.random.split(key, 3)
    x = jax.random.normal(kx, (B, S, D), dtype=jnp.float32)

    # deterministic demo sublayer: Linear(d_model, d_model)
    W = 0.02 * jax.random.normal(kw, (D, D), dtype=jnp.float32)
    b = jnp.zeros((D,), jnp.float32)
    sublayer = PallasLinear(W, b)

    block = SublayerConnection(d_model=D, dropout=0.1)

    # pure-JAX reference (eval mode: dropout = identity)
    mu = jnp.mean(x, axis=-1, keepdims=True)
    var = jnp.mean((x - mu) ** 2, axis=-1, keepdims=True)
    normed_ref = (x - mu) * lax.rsqrt(var + EPS)
    ref = x + (normed_ref.reshape(-1, D) @ W + b).reshape(x.shape)

    # fused path, eval mode
    out_eval = jax.block_until_ready(block(x, sublayer, training=False))
    assert jnp.allclose(out_eval, ref, atol=1e-4, rtol=1e-4), "fused eval mismatch"

    # generic (non-fused) path with an arbitrary callable, eval mode
    generic_sublayer = lambda h: linear(h.reshape(-1, D), W, b).reshape(h.shape)
    out_generic = jax.block_until_ready(block(x, generic_sublayer, training=False))
    assert jnp.allclose(out_generic, ref, atol=1e-4, rtol=1e-4), "generic eval mismatch"

    # training mode (stochastic dropout, deterministic key)
    out_train = jax.block_until_ready(block(x, sublayer, training=True, rng=kd))
    assert out_train.shape == x.shape and out_train.dtype == x.dtype
    assert bool(jnp.all(jnp.isfinite(out_train)))

    print("KERNEL_OK")
</pallas_src>

<mosaic_0001>
module attributes {stable_mosaic.version = 11 : i64} {
  func.func @fused_block_kernel(%arg0: i32, %arg1: memref<16x128xf32, #tpu.memory_space<vmem>>, %arg2: memref<1x128xf32, #tpu.memory_space<vmem>>, %arg3: memref<1x128xf32, #tpu.memory_space<vmem>>, %arg4: memref<128x128xf32, #tpu.memory_space<vmem>>, %arg5: memref<1x128xf32, #tpu.memory_space<vmem>>, %arg6: memref<16x128xf32, #tpu.memory_space<vmem>>) attributes {dimension_semantics = [#tpu.dimension_semantics<parallel>], iteration_bounds = array<i64: 1>, scalar_prefetch = 0 : i64, scratch_operands = 0 : i64, tpu.core_type = #tpu.core_type<tc>, window_params = [{transform_indices = @transform_0, window_bounds = array<i64: 16, 128>}, {pipeline_mode = #tpu.pipeline_mode<synchronous>, transform_indices = @transform_1, window_bounds = array<i64: 1, 128>}, {pipeline_mode = #tpu.pipeline_mode<synchronous>, transform_indices = @transform_2, window_bounds = array<i64: 1, 128>}, {pipeline_mode = #tpu.pipeline_mode<synchronous>, transform_indices = @transform_3, window_bounds = array<i64: 128, 128>}, {pipeline_mode = #tpu.pipeline_mode<synchronous>, transform_indices = @transform_4, window_bounds = array<i64: 1, 128>}, {transform_indices = @transform_5, window_bounds = array<i64: 16, 128>}]} {
    %c0 = arith.constant 0 : index
    %c0_0 = arith.constant 0 : index
    %0 = vector.load %arg1[%c0, %c0_0] : memref<16x128xf32, #tpu.memory_space<vmem>>, vector<16x128xf32>
    %cst = arith.constant dense<0.000000e+00> : vector<16xf32>
    %1 = vector.multi_reduction <add>, %0, %cst [1] : vector<16x128xf32> to vector<16xf32>
    %2 = vector.shape_cast %1 : vector<16xf32> to vector<16x1xf32>
    %cst_1 = arith.constant 1.280000e+02 : f32
    %3 = vector.broadcast %cst_1 : f32 to vector<16x1xf32>
    %4 = arith.divf %2, %3 : vector<16x1xf32>
    %5 = vector.broadcast %4 : vector<16x1xf32> to vector<16x128xf32>
    %6 = arith.subf %0, %5 : vector<16x128xf32>
    %7 = arith.mulf %6, %6 : vector<16x128xf32>
    %cst_2 = arith.constant dense<0.000000e+00> : vector<16xf32>
    %8 = vector.multi_reduction <add>, %7, %cst_2 [1] : vector<16x128xf32> to vector<16xf32>
    %9 = vector.shape_cast %8 : vector<16xf32> to vector<16x1xf32>
    %cst_3 = arith.constant 1.280000e+02 : f32
    %10 = vector.broadcast %cst_3 : f32 to vector<16x1xf32>
    %11 = arith.divf %9, %10 : vector<16x1xf32>
    %cst_4 = arith.constant 9.99999974E-6 : f32
    %12 = vector.broadcast %cst_4 : f32 to vector<16x1xf32>
    %13 = arith.addf %11, %12 : vector<16x1xf32>
    %14 = math.rsqrt %13 : vector<16x1xf32>
    %15 = vector.broadcast %14 : vector<16x1xf32> to vector<16x128xf32>
    %16 = arith.mulf %6, %15 : vector<16x128xf32>
    %c0_5 = arith.constant 0 : index
    %c0_6 = arith.constant 0 : index
    %17 = vector.load %arg2[%c0_5, %c0_6] : memref<1x128xf32, #tpu.memory_space<vmem>>, vector<1x128xf32>
    %18 = vector.broadcast %17 : vector<1x128xf32> to vector<16x128xf32>
    %19 = arith.mulf %16, %18 : vector<16x128xf32>
    %c0_7 = arith.constant 0 : index
    %c0_8 = arith.constant 0 : index
    %20 = vector.load %arg3[%c0_7, %c0_8] : memref<1x128xf32, #tpu.memory_space<vmem>>, vector<1x128xf32>
    %21 = vector.broadcast %20 : vector<1x128xf32> to vector<16x128xf32>
    %22 = arith.addf %19, %21 : vector<16x128xf32>
    %c0_9 = arith.constant 0 : index
    %c0_10 = arith.constant 0 : index
    %23 = vector.load %arg4[%c0_9, %c0_10] : memref<128x128xf32, #tpu.memory_space<vmem>>, vector<128x128xf32>
    %cst_11 = arith.constant dense<0.000000e+00> : vector<16x128xf32>
    %24 = tpu.matmul %22, %23, %cst_11 {dimension_numbers = #tpu.dot_dimension_numbers<[1], [0], [0], [1], [0, 0, 1, 1], [], []>} : vector<16x128xf32>, vector<128x128xf32>, vector<16x128xf32> -> vector<16x128xf32>
    %c0_12 = arith.constant 0 : index
    %c0_13 = arith.constant 0 : index
    %25 = vector.load %arg5[%c0_12, %c0_13] : memref<1x128xf32, #tpu.memory_space<vmem>>, vector<1x128xf32>
    %26 = vector.broadcast %25 : vector<1x128xf32> to vector<16x128xf32>
    %27 = arith.addf %24, %26 : vector<16x128xf32>
    %28 = arith.addf %0, %27 : vector<16x128xf32>
    %c0_14 = arith.constant 0 : index
    %c0_15 = arith.constant 0 : index
    %29 = vector.load %arg6[%c0_14, %c0_15] : memref<16x128xf32, #tpu.memory_space<vmem>>, vector<16x128xf32>
    tpu.vector_store %arg6[%c0_14, %c0_15], %28 {strides = array<i32>} : memref<16x128xf32, #tpu.memory_space<vmem>>, vector<16x128xf32>,
    return
  }
  func.func @transform_0(%arg0: i32) -> (i32, i32) {
    %c0_i32 = arith.constant 0 : i32
    %c0_i32_0 = arith.constant 0 : i32
    return %arg0, %c0_i32 : i32, i32
  }
  func.func @transform_1(%arg0: i32) -> (i32, i32) {
    %c0_i32 = arith.constant 0 : i32
    %c0_i32_0 = arith.constant 0 : i32
    %c0_i32_1 = arith.constant 0 : i32
    return %c0_i32, %c0_i32_0 : i32, i32
  }
  func.func @transform_2(%arg0: i32) -> (i32, i32) {
    %c0_i32 = arith.constant 0 : i32
    %c0_i32_0 = arith.constant 0 : i32
    %c0_i32_1 = arith.constant 0 : i32
    return %c0_i32, %c0_i32_0 : i32, i32
  }
  func.func @transform_3(%arg0: i32) -> (i32, i32) {
    %c0_i32 = arith.constant 0 : i32
    %c0_i32_0 = arith.constant 0 : i32
    %c0_i32_1 = arith.constant 0 : i32
    return %c0_i32, %c0_i32_0 : i32, i32
  }
  func.func @transform_4(%arg0: i32) -> (i32, i32) {
    %c0_i32 = arith.constant 0 : i32
    %c0_i32_0 = arith.constant 0 : i32
    %c0_i32_1 = arith.constant 0 : i32
    return %c0_i32, %c0_i32_0 : i32, i32
  }
  func.func @transform_5(%arg0: i32) -> (i32, i32) {
    %c0_i32 = arith.constant 0 : i32
    %c0_i32_0 = arith.constant 0 : i32
    return %arg0, %c0_i32 : i32, i32
  }
}

</mosaic_0001>

<bundles_post_ra>
// kernel: tpu_custom_call.1
= control target key start
LH: loop header
LB: loop body
LE: loop exit
PB: predicated region body
PF: predicated region fallthrough
CT: control target
= control target key end

     0   :  { %10 = vsyncpa [#allocation3], 0  ;;  %s480_s0 = inlined_call_operand.hbm [shape: f32[16,128], index: 0, kind: input, shape index: {}]   ;;  %s481_s1 = inlined_call_operand.vmem [shape: f32[1,128], index: 1, kind: input, shape index: {}]   ;;  %s482_s2 = inlined_call_operand.vmem [shape: f32[1,128], index: 2, kind: input, shape index: {}]   ;;  %s483_s3 = inlined_call_operand.hbm [shape: f32[128,128], index: 3, kind: input, shape index: {}]   ;;  %s484_s4 = inlined_call_operand.vmem [shape: f32[1,128], index: 4, kind: input, shape index: {}]   ;;  %s485_s5 = inlined_call_operand.hbm [shape: f32[16,128], index: 5, kind: output, shape index: {}]  }
   0x1   :  { %11 = vsyncpa [#allocation6], 0 }
   0x2   :  { %12 = vsyncpa [#allocation4], 0  ;;  %s381_s18 = smov [#allocation2]   ;;  %s309_s22 = scalar_lea.hbm %s480_s0, 256 }
   0x3   :  { %s18_s19 = sshll.u32 %s381_s18, 4  ;;  %p310_p0 = scmp.ne.s32.totalorder %s480_s0, %s309_s22  ;;  %s19_s19 = int_to_ptr.vmem [resolvable:$true] %s18_s19 }
   0x4   :  { %p313_p1 = scmp.lt.u32.totalorder %s309_s22, %s480_s0 }
   0x6   :  { %p315_p2 = pnand %p313_p1, %p310_p0 }
   0x8   :  { %318 = shalt.err (!%p315_p2)
}
   0x9   :  { %s319_s27 = scalar_lea.vmem %s19_s19, 256  ;;  %p324_p4 = scmp.lt.s32.totalorder %s19_s19, %s19_s19 }
   0xa   :  { %p320_p3 = scmp.ne.s32.totalorder %s19_s19, %s319_s27  ;;  %p325_p5 = scmp.lt.s32.totalorder %s319_s27, %s319_s27 }
   0xc   :  { %p326_p6 = por %p325_p5, %p324_p4 }
   0xe   :  { %p327_p7 = pnand %p326_p6, %p320_p3 }
  0x10   :  { %330 = shalt.err (!%p327_p7)
}
  0x11   :  { %s382_s28 = smov 128   ;;  %s383_s29 = smov 8  }
  0x12   :  { %24 = dma.hbm_to_vmem [thread:$0]  %s480_s0, 256, %s19_s19, [#allocation3], %s382_s28, %s382_s28, %s383_s29  }
  0x13   :  { %s384_s7 = smov [#allocation5]   ;;  %s331_s11 = scalar_lea.hbm %s483_s3, 2048 }
  0x14   :  { %s34_s8 = sshll.u32 %s384_s7, 4  ;;  %p332_p8 = scmp.ne.s32.totalorder %s483_s3, %s331_s11  ;;  %s35_s8 = int_to_ptr.vmem [resolvable:$true] %s34_s8 }
  0x15   :  { %p335_p9 = scmp.lt.u32.totalorder %s331_s11, %s483_s3 }
  0x17   :  { %p337_p10 = pnand %p335_p9, %p332_p8 }
  0x19   :  { %340 = shalt.err (!%p337_p10)
}
  0x1a   :  { %s341_s16 = scalar_lea.vmem %s35_s8, 2048  ;;  %p346_p12 = scmp.lt.s32.totalorder %s35_s8, %s35_s8 }
  0x1b   :  { %p342_p11 = scmp.ne.s32.totalorder %s35_s8, %s341_s16  ;;  %p347_p13 = scmp.lt.s32.totalorder %s341_s16, %s341_s16 }
  0x1d   :  { %p348_p0 = por %p347_p13, %p346_p12 }
  0x1f   :  { %p349_p1 = pnand %p348_p0, %p342_p11 }
  0x21   :  { %352 = shalt.err (!%p349_p1)
}
  0x22   :  { %40 = dma.hbm_to_vmem [thread:$0]  %s483_s3, 2048, %s35_s8, [#allocation6], %s382_s28, %s382_s28, %s383_s29  }
  0x23   :  { %375 = dma.done.wait [#allocation3], 256  }
  0x24   :  { %376 = vsyncadd [#allocation3], 4294967040 }
  0x25   :  { %377 = dma.done.wait [#allocation6], 2048  }
  0x26   :  { %378 = vsyncadd [#allocation6], 4294965248  ;;  %v446_v0 = vld [vmem:[#allocation2] sm:$0xff]  ;;  %v449_v1 = vld [vmem:[#allocation2 + $0x8] sm:$0xff] }
  0x27   :  { %51 = vadd.xlane.f32.xlu0 %v446_v0  ;;  %v92_v2 = vld [vmem:[#allocation5] sm:$0xff]  ;;  %v93_v3 = vld [vmem:[#allocation5 + $0x8] sm:$0xff]  ;;  %v94_v4 = vld [vmem:[#allocation5 + $0x10] sm:$0xff] }
  0x28   :  { %v268_v5 = vpack.c.bf16 %v93_v3, %v92_v2  ;;  %v95_v6 = vld [vmem:[#allocation5 + $0x18] sm:$0xff]  ;;  %v96_v16 = vld [vmem:[#allocation5 + $0x20] sm:$0xff]  ;;  %v97_v17 = vld [vmem:[#allocation5 + $0x28] sm:$0xff] }
  0x29   :  { %v272_v7 = vpack.c.bf16 %v95_v6, %v94_v4  ;;  %v276_v18 = vpack.c.bf16 %v97_v17, %v96_v16  ;;  %v98_v19 = vld [vmem:[#allocation5 + $0x30] sm:$0xff]  ;;  %v99_v20 = vld [vmem:[#allocation5 + $0x38] sm:$0xff]  ;;  %v100_v22 = vld [vmem:[#allocation5 + $0x40] sm:$0xff] }
  0x2a   :  { %269 = vmatprep.subr.bf16.mxu0 %v268_v5  ;;  %v280_v21 = vpack.c.bf16 %v99_v20, %v98_v19  ;;  %v101_v23 = vld [vmem:[#allocation5 + $0x48] sm:$0xff]  ;;  %v102_v25 = vld [vmem:[#allocation5 + $0x50] sm:$0xff]  ;;  %v103_v26 = vld [vmem:[#allocation5 + $0x58] sm:$0xff] }
  0x2b   :  { %53 = vadd.xlane.f32.xlu0 %v449_v1  ;;  %271 = vmatpush3.bf16.msra.mxu0 %v268_v5  ;;  %v284_v24 = vpack.c.bf16 %v101_v23, %v100_v22  ;;  %v104_v27 = vld [vmem:[#allocation5 + $0x60] sm:$0xff]  ;;  %v288_v28 = vpack.c.bf16 %v103_v26, %v102_v25  ;;  %v105_v29 = vld [vmem:[#allocation5 + $0x68] sm:$0xff]  ;;  %v106_v31 = vld [vmem:[#allocation5 + $0x70] sm:$0xff] }
  0x2c   :  { %273 = vmatprep.subr.bf16.mxu0 %v272_v7  ;;  %v292_v30 = vpack.c.bf16 %v105_v29, %v104_v27  ;;  %v107_v32 = vld [vmem:[#allocation5 + $0x78] sm:$0xff]  ;;  %v212_v41 = vld [vmem:[%s481_s1] ss:$0 sm:$0xff]  ;;  %s385_s1 = smov [#allocation7]  }
  0x2d   :  { %v296_v33 = vpack.c.bf16 %v107_v32, %v106_v31  ;;  %v213_v43 = vld [vmem:[%s482_s2] ss:$0 sm:$0xff]  ;;  %s199_s23 = sshll.u32 %s385_s1, 4  ;;  %s200_s23 = int_to_ptr.vmem [resolvable:$true] %s199_s23 }
  0x2e   :  { %v214_v50 = vld [vmem:[%s484_s4] ss:$0 sm:$0xff]  ;;  %s353_s2 = scalar_lea.vmem %s200_s23, 256  ;;  %p358_p3 = scmp.lt.s32.totalorder %s200_s23, %s200_s23 }
  0x2f   :  { %275 = vmatpush3.bf16.msra.mxu0 %v272_v7  ;;  %p354_p2 = scmp.ne.s32.totalorder %s200_s23, %s353_s2  ;;  %p359_p4 = scmp.lt.s32.totalorder %s353_s2, %s353_s2 }
  0x30   :  { %277 = vmatprep.subr.bf16.mxu0 %v276_v18 }
  0x31   :  { %p360_p5 = por %p359_p4, %p358_p3 }
  0x33   :  { %279 = vmatpush3.bf16.msra.mxu0 %v276_v18  ;;  %p361_p6 = pnand %p360_p5, %p354_p2 }
  0x34   :  { %281 = vmatprep.subr.bf16.mxu0 %v280_v21 }
  0x37   :  { %283 = vmatpush3.bf16.msra.mxu0 %v280_v21 }
  0x38   :  { %285 = vmatprep.subr.bf16.mxu0 %v284_v24 }
  0x3b   :  { %287 = vmatpush3.bf16.msra.mxu0 %v284_v24 }
  0x3c   :  { %289 = vmatprep.subr.bf16.mxu0 %v288_v28 }
  0x3f   :  { %291 = vmatpush3.bf16.msra.mxu0 %v288_v28 }
  0x40   :  { %293 = vmatprep.subr.bf16.mxu0 %v292_v30 }
  0x43   :  { %295 = vmatpush3.bf16.msra.mxu0 %v292_v30 }
  0x44   :  { %297 = vmatprep.subr.bf16.mxu0 %v296_v33 }
  0x47   :  { %299 = vmatpush3.bf16.msra.mxu0 %v296_v33 }
  0xb4   :  { %v52_v8 = vpop.xlane.xlu0 %51 }
  0xb5   :  { %v56_v9 = vmul.f32 0.0078125, %v52_v8 }
  0xb7   :  { %v58_v10 = vsub.f32 %v446_v0, %v56_v9 }
  0xb8   :  { %v54_v11 = vpop.xlane.xlu0 %53 }
  0xb9   :  { %v57_v12 = vmul.f32 0.0078125, %v54_v11  ;;  %v60_v13 = vmul.f32 %v58_v10, %v58_v10 }
  0xbb   :  { %v59_v14 = vsub.f32 %v449_v1, %v57_v12  ;;  %62 = vadd.xlane.f32.xlu1 %v60_v13 }
  0xbd   :  { %v61_v15 = vmul.f32 %v59_v14, %v59_v14 }
  0xbf   :  { %64 = vadd.xlane.f32.xlu1 %v61_v15 }
 0x148   :  { %v63_v34 = vpop.xlane.xlu1 %62 }
 0x149   :  { %v66_v35 = vmul.f32 0.0078125, %v63_v34 }
 0x14b   :  { %v68_v36 = vadd.f32 1e-05, %v66_v35 }
 0x14c   :  { %v65_v37 = vpop.xlane.xlu1 %64 }
 0x14d   :  { %305 = vrsqrt.f32 %v68_v36  ;;  %v67_v38 = vmul.f32 0.0078125, %v65_v37 }
 0x14f   :  { %v69_v39 = vadd.f32 1e-05, %v67_v38 }
 0x151   :  { %307 = vrsqrt.f32 %v69_v39 }
 0x157   :  { %v306_v40 = vpop.eup %305 }
 0x158   :  { %v72_v42 = vmul.f32 %v306_v40, %v58_v10 }
 0x15a   :  { %v81_v44 = vmul.f32 %v212_v41, %v72_v42 }
 0x15b   :  { %v308_v45 = vpop.eup %307 }
 0x15c   :  { %v73_v46 = vmul.f32 %v308_v45, %v59_v14  ;;  %v90_v47 = vadd.f32 %v213_v43, %v81_v44 }
 0x15e   :  { %v82_v48 = vmul.f32 %v212_v41, %v73_v46  ;;  %265 = vmatprep.mubr.f32.mxu0 %v90_v47 }
 0x160   :  { %v91_v49 = vadd.f32 %v213_v43, %v82_v48 }
 0x162   :  { %266 = vmatmul.mubr.f32.vlgmr.msra.gmra.mrb[0].mxu0 %v91_v49 }
 0x235   :  { %v267_v51 = vpop.f32.mrb[0].mxu0 }
 0x236   :  { %v187_v52 = vadd.f32 %v267_v51, %v214_v50  ;;  %v181_v53 = vpop.f32.mrb[1].mxu0 }
 0x237   :  { %v182_v54 = vadd.f32 %v214_v50, %v181_v53 }
 0x238   :  { %v191_v55 = vadd.f32 %v187_v52, %v449_v1 }
 0x239   :  { %v190_v56 = vadd.f32 %v182_v54, %v446_v0 }
 0x23a   :  { %193 = vst [vmem:[#allocation7 + $0x8] sm:$0xff] %v191_v55 }
 0x23b   :  { %192 = vst [vmem:[#allocation7] sm:$0xff] %v190_v56 }
 0x23c   :  { %364 = shalt.err (!%p361_p6)
}
 0x23d   :  { %s365_s25 = scalar_lea.hbm %s485_s5, 256 }
 0x23e   :  { %p366_p7 = scmp.ne.s32.totalorder %s485_s5, %s365_s25  ;;  %p369_p8 = scmp.lt.u32.totalorder %s365_s25, %s485_s5 }
 0x240   :  { %p371_p9 = pnand %p369_p8, %p366_p7 }
 0x242   :  { %374 = shalt.err (!%p371_p9)
}
 0x243   :  { %205 = dma.vmem_to_hbm [thread:$0]  %s200_s23, 256, %s485_s5, [#allocation4], %s382_s28, %s382_s28, %s383_s29  }
 0x244   :  { %379 = dma.done.wait [#allocation4], 256  }
 0x245   :  { %380 = vsyncadd [#allocation4], 4294967040 }
 0x246   :  { %209 = vsyncpa [#allocation3], 1 }
 0x247   :  { %210 = vsyncpa [#allocation6], 1 }
 0x248   :  { %211 = vsyncpa [#allocation4], 1 }

</bundles_post_ra>
